<compile_context>
chip_gen: v7x
topology: tpu7x:2x2x1
jax: 0.10.0
libtpu: 0.0.40
codegen_flags: <defaults>
</compile_context>

<pallas_src>
import functools

import jax
import jax.numpy as jnp
from jax.experimental import pallas as pl
from jax.experimental.pallas import tpu as pltpu

_C1 = 0.01 ** 2
_C2 = 0.03 ** 2
# 3x3 average-pool factor (1/9) folded into the constants (window sums are
# unnormalized, so C1/C2 are scaled by 9*9 = 81; the 1/6561 cancels in n/d).
_C1S = 81.0 * _C1
_C2S = 81.0 * _C2


def _ssim_kernel(x_ref, y_ref, out_ref, *, h_period, w_period):
    """One block of stacked image planes.

    Two layouts share this body (only the reflection periods differ):
      * row-stacked : block = (TB*H, W)   planes stacked on sublanes
      * lane-packed : block = (H, TL*W)   planes concatenated along lanes
    ReflectionPad2d(1) is synthesized with wrap-around rolls whose wrapped
    operand is masked back to the in-plane neighbour before summing.
    """
    x = x_ref[...].astype(jnp.float32)
    y = y_ref[...].astype(jnp.float32)
    rows, lanes = x.shape

    # Small broadcastable boundary masks: (1, lanes) and (rows, 1).
    col = jax.lax.broadcasted_iota(jnp.int32, (1, lanes), 1) % w_period
    row = jax.lax.broadcasted_iota(jnp.int32, (rows, 1), 0) % h_period
    col_first = col == 0
    col_last = col == w_period - 1
    row_first = row == 0
    row_last = row == h_period - 1

    def hsum3(a):
        # 3-tap horizontal window sum with per-plane reflection boundary.
        left = pltpu.roll(a, 1, 1)            # a[:, j-1]  (wraps)
        right = pltpu.roll(a, lanes - 1, 1)   # a[:, j+1]  (wraps)
        lfix = jnp.where(col_first, right, left)   # reflect: use a[:, j+1]
        rfix = jnp.where(col_last, left, right)    # reflect: use a[:, j-1]
        return lfix + a + rfix

    def vsum3(a):
        # 3-tap vertical window sum with per-plane reflection boundary.
        up = pltpu.roll(a, 1, 0)              # a[i-1, :]  (wraps)
        down = pltpu.roll(a, rows - 1, 0)     # a[i+1, :]  (wraps)
        ufix = jnp.where(row_first, down, up)
        dfix = jnp.where(row_last, up, down)
        return ufix + a + dfix

    # Unnormalized 3x3 window sums (separable stencil).
    sx = vsum3(hsum3(x))
    sy = vsum3(hsum3(y))
    sxx = vsum3(hsum3(x * x))
    syy = vsum3(hsum3(y * y))
    sxy = vsum3(hsum3(x * y))

    # SSIM with the 1/9 factors folded into the constants:
    #   n / d == SSIM_n / SSIM_d of the reference (both scaled by 81*81).
    a2 = 2.0 * (sx * sy)
    n = (a2 + _C1S) * (18.0 * sxy - a2 + _C2S)
    bb = sx * sx + sy * sy
    d = (bb + _C1S) * (9.0 * (sxx + syy) - bb + _C2S)

    # Divide on the EUP: approx reciprocal (~12-bit) + one Newton step.
    r = pl.reciprocal(d, approx=True)
    r = r * (2.0 - d * r)
    res = jnp.clip((1.0 - n * r) * 0.5, 0.0, 1.0)
    out_ref[...] = res.astype(out_ref.dtype)


def _pick_planes_per_block(P, per_plane_bytes, aligned, budget_bytes):
    """Largest divisor of P whose per-input block fits the byte budget."""
    divisors = [d for d in range(1, P + 1) if P % d == 0]
    ok = [d for d in divisors if aligned(d)] or [P]
    within = [d for d in ok if d * per_plane_bytes <= budget_bytes]
    if not within:
        # TODO(synk): tile over H with a 1-row halo (manual pl.ANY +
        # make_async_copy of (tile_h+2, W)) when even a single plane exceeds
        # the budget, so very large images fit v7x's 64 MiB VMEM.
        return min(ok)
    best = max(within)
    if P // best < 4:
        # Large inputs: prefer >=4 grid steps (megacore split + DMA/compute
        # overlap) as long as blocks stay >= 512 KiB.
        cand = [d for d in within
                if P // d >= 4 and d * per_plane_bytes >= (512 << 10)]
        if cand:
            best = max(cand)
    return best


def ssim_loss(x, y):
    """SSIM loss map, matching torch SSIM().forward(x, y). x, y: (N, C, H, W)."""
    N, C, H, W = x.shape
    if H < 2 or W < 2:
        raise ValueError("SSIM requires H, W >= 2 (ReflectionPad2d(1)).")
    P = N * C
    itemsize = jnp.dtype(x.dtype).itemsize
    per_plane_bytes = H * W * itemsize
    budget = 2 << 20  # ~2 MiB per input block; live f32 temps are ~12-15x this

    lane_packed = W < 128
    if lane_packed:
        # Lane-dense layout: planes concatenated along lanes -> (H, P*W).
        x2 = x.reshape(P, H, W).transpose(1, 0, 2).reshape(H, P * W)
        y2 = y.reshape(P, H, W).transpose(1, 0, 2).reshape(H, P * W)

        def aligned(d):
            return (d * W) % 128 == 0 or d == P

        tl = _pick_planes_per_block(P, per_plane_bytes, aligned, budget)
        block_shape = (H, tl * W)
        grid = (P // tl,)
        spec = pl.BlockSpec(block_shape, lambda i: (0, i))
        flat_shape = (H, P * W)
    else:
        # Row-stacked layout: planes stacked on sublanes -> (P*H, W).
        x2 = x.reshape(P * H, W)
        y2 = y.reshape(P * H, W)

        def aligned(d):
            return (d * H) % 8 == 0 or d == P

        tb = _pick_planes_per_block(P, per_plane_bytes, aligned, budget)
        block_shape = (tb * H, W)
        grid = (P // tb,)
        spec = pl.BlockSpec(block_shape, lambda i: (i, 0))
        flat_shape = (P * H, W)

    # VMEM limit sized for the real footprint (pipelined I/O + f32 temps),
    # clamped to stay sane on v7x (64 MiB/TC) and v5e/v6e (128 MiB).
    block_f32_bytes = block_shape[0] * block_shape[1] * 4
    vmem_limit = int(min(128 << 20, max(32 << 20, 24 * block_f32_bytes)))

    out = pl.pallas_call(
        functools.partial(_ssim_kernel, h_period=H, w_period=W),
        out_shape=jax.ShapeDtypeStruct(flat_shape, x.dtype),
        grid=grid,
        in_specs=[spec, spec],
        out_specs=spec,
        compiler_params=pltpu.CompilerParams(
            dimension_semantics=("parallel",),
            vmem_limit_bytes=vmem_limit,
        ),
    )(x2, y2)

    if lane_packed:
        return out.reshape(H, P, W).transpose(1, 0, 2).reshape(N, C, H, W)
    return out.reshape(N, C, H, W)


def _ssim_ref(x, y):
    """Pure-JAX reference identical to the PyTorch module (for verification)."""
    xp = jnp.pad(x, ((0, 0), (0, 0), (1, 1), (1, 1)), mode="reflect")
    yp = jnp.pad(y, ((0, 0), (0, 0), (1, 1), (1, 1)), mode="reflect")

    def pool(a):
        n, c, hp, wp = a.shape
        h, w = hp - 2, wp - 2
        s = jnp.zeros((n, c, h, w), jnp.float32)
        for di in range(3):
            for dj in range(3):
                s = s + a[:, :, di:di + h, dj:dj + w]
        return s / 9.0

    mu_x = pool(xp)
    mu_y = pool(yp)
    sx = pool(xp * xp) - mu_x ** 2
    sy = pool(yp * yp) - mu_y ** 2
    sxy = pool(xp * yp) - mu_x * mu_y
    n = (2 * mu_x * mu_y + _C1) * (2 * sxy + _C2)
    d = (mu_x ** 2 + mu_y ** 2 + _C1) * (sx + sy + _C2)
    return jnp.clip((1 - n / d) / 2, 0.0, 1.0)


if __name__ == "__main__":
    key = jax.random.PRNGKey(0)
    kx, ky = jax.random.split(key)
    N, C, H, W = 2, 4, 16, 16
    x = jax.random.uniform(kx, (N, C, H, W), dtype=jnp.float32)
    y = jax.random.uniform(ky, (N, C, H, W), dtype=jnp.float32)

    out = jax.block_until_ready(ssim_loss(x, y))
    assert out.shape == (N, C, H, W)

    ref = jax.block_until_ready(_ssim_ref(x, y))
    assert jnp.allclose(out, ref, rtol=1e-4, atol=1e-4)
    print("KERNEL_OK")
</pallas_src>

<mosaic_0001>
module attributes {stable_mosaic.version = 11 : i64} {
  func.func @_ssim_kernel(%arg0: i32, %arg1: memref<16x128xf32, #tpu.memory_space<vmem>>, %arg2: memref<16x128xf32, #tpu.memory_space<vmem>>, %arg3: memref<16x128xf32, #tpu.memory_space<vmem>>) attributes {dimension_semantics = [#tpu.dimension_semantics<parallel>], iteration_bounds = array<i64: 1>, scalar_prefetch = 0 : i64, scratch_operands = 0 : i64, tpu.core_type = #tpu.core_type<tc>, window_params = [{transform_indices = @transform_0, window_bounds = array<i64: 16, 128>}, {transform_indices = @transform_1, window_bounds = array<i64: 16, 128>}, {transform_indices = @transform_2, window_bounds = array<i64: 16, 128>}]} {
    %c0 = arith.constant 0 : index
    %c0_0 = arith.constant 0 : index
    %0 = vector.load %arg1[%c0, %c0_0] : memref<16x128xf32, #tpu.memory_space<vmem>>, vector<16x128xf32>
    %c0_1 = arith.constant 0 : index
    %c0_2 = arith.constant 0 : index
    %1 = vector.load %arg2[%c0_1, %c0_2] : memref<16x128xf32, #tpu.memory_space<vmem>>, vector<16x128xf32>
    %2 = tpu.iota {dimensions = array<i32: 1>} : vector<1x128xi32>
    %c16_i32 = arith.constant 16 : i32
    %c0_i32 = arith.constant 0 : i32
    %3 = arith.cmpi eq, %c16_i32, %c0_i32 : i32
    %c1_i32 = arith.constant 1 : i32
    %4 = arith.select %3, %c1_i32, %c16_i32 : i32
    %5 = vector.broadcast %4 : i32 to vector<1x128xi32>
    %6 = arith.remsi %2, %5 : vector<1x128xi32>
    %c0_i32_3 = arith.constant 0 : i32
    %7 = vector.broadcast %c0_i32_3 : i32 to vector<1x128xi32>
    %8 = arith.cmpi ne, %6, %7 : vector<1x128xi32>
    %c0_i32_4 = arith.constant 0 : i32
    %9 = vector.broadcast %c0_i32_4 : i32 to vector<1x128xi32>
    %10 = arith.cmpi slt, %6, %9 : vector<1x128xi32>
    %c0_i32_5 = arith.constant 0 : i32
    %11 = arith.cmpi slt, %4, %c0_i32_5 : i32
    %12 = vector.broadcast %11 : i1 to vector<1x128xi1>
    %13 = vector.broadcast %12 : vector<1x128xi1> to vector<1x128xi1>
    %14 = arith.xori %10, %13 : vector<1x128xi1>
    %15 = arith.andi %14, %8 : vector<1x128xi1>
    %16 = vector.broadcast %4 : i32 to vector<1x128xi32>
    %17 = arith.addi %6, %16 : vector<1x128xi32>
    %18 = arith.select %15, %17, %6 : vector<1x128xi1>, vector<1x128xi32>
    %19 = tpu.iota {dimensions = array<i32: 0>} : vector<16x1xi32>
    %c16_i32_6 = arith.constant 16 : i32
    %c0_i32_7 = arith.constant 0 : i32
    %20 = arith.cmpi eq, %c16_i32_6, %c0_i32_7 : i32
    %c1_i32_8 = arith.constant 1 : i32
    %21 = arith.select %20, %c1_i32_8, %c16_i32_6 : i32
    %22 = vector.broadcast %21 : i32 to vector<16x1xi32>
    %23 = arith.remsi %19, %22 : vector<16x1xi32>
    %c0_i32_9 = arith.constant 0 : i32
    %24 = vector.broadcast %c0_i32_9 : i32 to vector<16x1xi32>
    %25 = arith.cmpi ne, %23, %24 : vector<16x1xi32>
    %c0_i32_10 = arith.constant 0 : i32
    %26 = vector.broadcast %c0_i32_10 : i32 to vector<16x1xi32>
    %27 = arith.cmpi slt, %23, %26 : vector<16x1xi32>
    %c0_i32_11 = arith.constant 0 : i32
    %28 = arith.cmpi slt, %21, %c0_i32_11 : i32
    %29 = vector.broadcast %28 : i1 to vector<16x1xi1>
    %30 = vector.broadcast %29 : vector<16x1xi1> to vector<16x1xi1>
    %31 = arith.xori %27, %30 : vector<16x1xi1>
    %32 = arith.andi %31, %25 : vector<16x1xi1>
    %33 = vector.broadcast %21 : i32 to vector<16x1xi32>
    %34 = arith.addi %23, %33 : vector<16x1xi32>
    %35 = arith.select %32, %34, %23 : vector<16x1xi1>, vector<16x1xi32>
    %c0_i32_12 = arith.constant 0 : i32
    %36 = vector.broadcast %c0_i32_12 : i32 to vector<1x128xi32>
    %37 = arith.cmpi eq, %18, %36 : vector<1x128xi32>
    %c15_i32 = arith.constant 15 : i32
    %38 = vector.broadcast %c15_i32 : i32 to vector<1x128xi32>
    %39 = arith.cmpi eq, %18, %38 : vector<1x128xi32>
    %c0_i32_13 = arith.constant 0 : i32
    %40 = vector.broadcast %c0_i32_13 : i32 to vector<16x1xi32>
    %41 = arith.cmpi eq, %35, %40 : vector<16x1xi32>
    %c15_i32_14 = arith.constant 15 : i32
    %42 = vector.broadcast %c15_i32_14 : i32 to vector<16x1xi32>
    %43 = arith.cmpi eq, %35, %42 : vector<16x1xi32>
    %c1_i32_15 = arith.constant 1 : i32
    %44 = tpu.dynamic_rotate %0 by %c1_i32_15 dim 1 : vector<16x128xf32>, i32 -> vector<16x128xf32>
    %c127_i32 = arith.constant 127 : i32
    %45 = tpu.dynamic_rotate %0 by %c127_i32 dim 1 : vector<16x128xf32>, i32 -> vector<16x128xf32>
    %46 = vector.shape_cast %37 : vector<1x128xi1> to vector<1x128xi1>
    %47 = vector.broadcast %46 : vector<1x128xi1> to vector<16x128xi1>
    %48 = arith.select %47, %45, %44 : vector<16x128xi1>, vector<16x128xf32>
    %49 = vector.shape_cast %39 : vector<1x128xi1> to vector<1x128xi1>
    %50 = vector.broadcast %49 : vector<1x128xi1> to vector<16x128xi1>
    %51 = arith.select %50, %44, %45 : vector<16x128xi1>, vector<16x128xf32>
    %52 = arith.addf %48, %0 : vector<16x128xf32>
    %53 = arith.addf %52, %51 : vector<16x128xf32>
    %c1_i32_16 = arith.constant 1 : i32
    %54 = tpu.dynamic_rotate %53 by %c1_i32_16 dim 0 : vector<16x128xf32>, i32 -> vector<16x128xf32>
    %c15_i32_17 = arith.constant 15 : i32
    %55 = tpu.dynamic_rotate %53 by %c15_i32_17 dim 0 : vector<16x128xf32>, i32 -> vector<16x128xf32>
    %56 = vector.shape_cast %41 : vector<16x1xi1> to vector<16x1xi1>
    %57 = vector.broadcast %56 : vector<16x1xi1> to vector<16x128xi1>
    %58 = arith.select %57, %55, %54 : vector<16x128xi1>, vector<16x128xf32>
    %59 = vector.shape_cast %43 : vector<16x1xi1> to vector<16x1xi1>
    %60 = vector.broadcast %59 : vector<16x1xi1> to vector<16x128xi1>
    %61 = arith.select %60, %54, %55 : vector<16x128xi1>, vector<16x128xf32>
    %62 = arith.addf %58, %53 : vector<16x128xf32>
    %63 = arith.addf %62, %61 : vector<16x128xf32>
    %c1_i32_18 = arith.constant 1 : i32
    %64 = tpu.dynamic_rotate %1 by %c1_i32_18 dim 1 : vector<16x128xf32>, i32 -> vector<16x128xf32>
    %c127_i32_19 = arith.constant 127 : i32
    %65 = tpu.dynamic_rotate %1 by %c127_i32_19 dim 1 : vector<16x128xf32>, i32 -> vector<16x128xf32>
    %66 = vector.shape_cast %37 : vector<1x128xi1> to vector<1x128xi1>
    %67 = vector.broadcast %66 : vector<1x128xi1> to vector<16x128xi1>
    %68 = arith.select %67, %65, %64 : vector<16x128xi1>, vector<16x128xf32>
    %69 = vector.shape_cast %39 : vector<1x128xi1> to vector<1x128xi1>
    %70 = vector.broadcast %69 : vector<1x128xi1> to vector<16x128xi1>
    %71 = arith.select %70, %64, %65 : vector<16x128xi1>, vector<16x128xf32>
    %72 = arith.addf %68, %1 : vector<16x128xf32>
    %73 = arith.addf %72, %71 : vector<16x128xf32>
    %c1_i32_20 = arith.constant 1 : i32
    %74 = tpu.dynamic_rotate %73 by %c1_i32_20 dim 0 : vector<16x128xf32>, i32 -> vector<16x128xf32>
    %c15_i32_21 = arith.constant 15 : i32
    %75 = tpu.dynamic_rotate %73 by %c15_i32_21 dim 0 : vector<16x128xf32>, i32 -> vector<16x128xf32>
    %76 = vector.shape_cast %41 : vector<16x1xi1> to vector<16x1xi1>
    %77 = vector.broadcast %76 : vector<16x1xi1> to vector<16x128xi1>
    %78 = arith.select %77, %75, %74 : vector<16x128xi1>, vector<16x128xf32>
    %79 = vector.shape_cast %43 : vector<16x1xi1> to vector<16x1xi1>
    %80 = vector.broadcast %79 : vector<16x1xi1> to vector<16x128xi1>
    %81 = arith.select %80, %74, %75 : vector<16x128xi1>, vector<16x128xf32>
    %82 = arith.addf %78, %73 : vector<16x128xf32>
    %83 = arith.addf %82, %81 : vector<16x128xf32>
    %84 = arith.mulf %0, %0 : vector<16x128xf32>
    %c1_i32_22 = arith.constant 1 : i32
    %85 = tpu.dynamic_rotate %84 by %c1_i32_22 dim 1 : vector<16x128xf32>, i32 -> vector<16x128xf32>
    %c127_i32_23 = arith.constant 127 : i32
    %86 = tpu.dynamic_rotate %84 by %c127_i32_23 dim 1 : vector<16x128xf32>, i32 -> vector<16x128xf32>
    %87 = vector.shape_cast %37 : vector<1x128xi1> to vector<1x128xi1>
    %88 = vector.broadcast %87 : vector<1x128xi1> to vector<16x128xi1>
    %89 = arith.select %88, %86, %85 : vector<16x128xi1>, vector<16x128xf32>
    %90 = vector.shape_cast %39 : vector<1x128xi1> to vector<1x128xi1>
    %91 = vector.broadcast %90 : vector<1x128xi1> to vector<16x128xi1>
    %92 = arith.select %91, %85, %86 : vector<16x128xi1>, vector<16x128xf32>
    %93 = arith.addf %89, %84 : vector<16x128xf32>
    %94 = arith.addf %93, %92 : vector<16x128xf32>
    %c1_i32_24 = arith.constant 1 : i32
    %95 = tpu.dynamic_rotate %94 by %c1_i32_24 dim 0 : vector<16x128xf32>, i32 -> vector<16x128xf32>
    %c15_i32_25 = arith.constant 15 : i32
    %96 = tpu.dynamic_rotate %94 by %c15_i32_25 dim 0 : vector<16x128xf32>, i32 -> vector<16x128xf32>
    %97 = vector.shape_cast %41 : vector<16x1xi1> to vector<16x1xi1>
    %98 = vector.broadcast %97 : vector<16x1xi1> to vector<16x128xi1>
    %99 = arith.select %98, %96, %95 : vector<16x128xi1>, vector<16x128xf32>
    %100 = vector.shape_cast %43 : vector<16x1xi1> to vector<16x1xi1>
    %101 = vector.broadcast %100 : vector<16x1xi1> to vector<16x128xi1>
    %102 = arith.select %101, %95, %96 : vector<16x128xi1>, vector<16x128xf32>
    %103 = arith.addf %99, %94 : vector<16x128xf32>
    %104 = arith.addf %103, %102 : vector<16x128xf32>
    %105 = arith.mulf %1, %1 : vector<16x128xf32>
    %c1_i32_26 = arith.constant 1 : i32
    %106 = tpu.dynamic_rotate %105 by %c1_i32_26 dim 1 : vector<16x128xf32>, i32 -> vector<16x128xf32>
    %c127_i32_27 = arith.constant 127 : i32
    %107 = tpu.dynamic_rotate %105 by %c127_i32_27 dim 1 : vector<16x128xf32>, i32 -> vector<16x128xf32>
    %108 = vector.shape_cast %37 : vector<1x128xi1> to vector<1x128xi1>
    %109 = vector.broadcast %108 : vector<1x128xi1> to vector<16x128xi1>
    %110 = arith.select %109, %107, %106 : vector<16x128xi1>, vector<16x128xf32>
    %111 = vector.shape_cast %39 : vector<1x128xi1> to vector<1x128xi1>
    %112 = vector.broadcast %111 : vector<1x128xi1> to vector<16x128xi1>
    %113 = arith.select %112, %106, %107 : vector<16x128xi1>, vector<16x128xf32>
    %114 = arith.addf %110, %105 : vector<16x128xf32>
    %115 = arith.addf %114, %113 : vector<16x128xf32>
    %c1_i32_28 = arith.constant 1 : i32
    %116 = tpu.dynamic_rotate %115 by %c1_i32_28 dim 0 : vector<16x128xf32>, i32 -> vector<16x128xf32>
    %c15_i32_29 = arith.constant 15 : i32
    %117 = tpu.dynamic_rotate %115 by %c15_i32_29 dim 0 : vector<16x128xf32>, i32 -> vector<16x128xf32>
    %118 = vector.shape_cast %41 : vector<16x1xi1> to vector<16x1xi1>
    %119 = vector.broadcast %118 : vector<16x1xi1> to vector<16x128xi1>
    %120 = arith.select %119, %117, %116 : vector<16x128xi1>, vector<16x128xf32>
    %121 = vector.shape_cast %43 : vector<16x1xi1> to vector<16x1xi1>
    %122 = vector.broadcast %121 : vector<16x1xi1> to vector<16x128xi1>
    %123 = arith.select %122, %116, %117 : vector<16x128xi1>, vector<16x128xf32>
    %124 = arith.addf %120, %115 : vector<16x128xf32>
    %125 = arith.addf %124, %123 : vector<16x128xf32>
    %126 = arith.mulf %0, %1 : vector<16x128xf32>
    %c1_i32_30 = arith.constant 1 : i32
    %127 = tpu.dynamic_rotate %126 by %c1_i32_30 dim 1 : vector<16x128xf32>, i32 -> vector<16x128xf32>
    %c127_i32_31 = arith.constant 127 : i32
    %128 = tpu.dynamic_rotate %126 by %c127_i32_31 dim 1 : vector<16x128xf32>, i32 -> vector<16x128xf32>
    %129 = vector.shape_cast %37 : vector<1x128xi1> to vector<1x128xi1>
    %130 = vector.broadcast %129 : vector<1x128xi1> to vector<16x128xi1>
    %131 = arith.select %130, %128, %127 : vector<16x128xi1>, vector<16x128xf32>
    %132 = vector.shape_cast %39 : vector<1x128xi1> to vector<1x128xi1>
    %133 = vector.broadcast %132 : vector<1x128xi1> to vector<16x128xi1>
    %134 = arith.select %133, %127, %128 : vector<16x128xi1>, vector<16x128xf32>
    %135 = arith.addf %131, %126 : vector<16x128xf32>
    %136 = arith.addf %135, %134 : vector<16x128xf32>
    %c1_i32_32 = arith.constant 1 : i32
    %137 = tpu.dynamic_rotate %136 by %c1_i32_32 dim 0 : vector<16x128xf32>, i32 -> vector<16x128xf32>
    %c15_i32_33 = arith.constant 15 : i32
    %138 = tpu.dynamic_rotate %136 by %c15_i32_33 dim 0 : vector<16x128xf32>, i32 -> vector<16x128xf32>
    %139 = vector.shape_cast %41 : vector<16x1xi1> to vector<16x1xi1>
    %140 = vector.broadcast %139 : vector<16x1xi1> to vector<16x128xi1>
    %141 = arith.select %140, %138, %137 : vector<16x128xi1>, vector<16x128xf32>
    %142 = vector.shape_cast %43 : vector<16x1xi1> to vector<16x1xi1>
    %143 = vector.broadcast %142 : vector<16x1xi1> to vector<16x128xi1>
    %144 = arith.select %143, %137, %138 : vector<16x128xi1>, vector<16x128xf32>
    %145 = arith.addf %141, %136 : vector<16x128xf32>
    %146 = arith.addf %145, %144 : vector<16x128xf32>
    %147 = arith.mulf %63, %83 : vector<16x128xf32>
    %cst = arith.constant 2.000000e+00 : f32
    %148 = vector.broadcast %cst : f32 to vector<16x128xf32>
    %149 = arith.mulf %148, %147 : vector<16x128xf32>
    %cst_34 = arith.constant 8.100000e-03 : f32
    %150 = vector.broadcast %cst_34 : f32 to vector<16x128xf32>
    %151 = arith.addf %149, %150 : vector<16x128xf32>
    %cst_35 = arith.constant 1.800000e+01 : f32
    %152 = vector.broadcast %cst_35 : f32 to vector<16x128xf32>
    %153 = arith.mulf %152, %146 : vector<16x128xf32>
    %154 = arith.subf %153, %149 : vector<16x128xf32>
    %cst_36 = arith.constant 7.290000e-02 : f32
    %155 = vector.broadcast %cst_36 : f32 to vector<16x128xf32>
    %156 = arith.addf %154, %155 : vector<16x128xf32>
    %157 = arith.mulf %151, %156 : vector<16x128xf32>
    %158 = arith.mulf %63, %63 : vector<16x128xf32>
    %159 = arith.mulf %83, %83 : vector<16x128xf32>
    %160 = arith.addf %158, %159 : vector<16x128xf32>
    %cst_37 = arith.constant 8.100000e-03 : f32
    %161 = vector.broadcast %cst_37 : f32 to vector<16x128xf32>
    %162 = arith.addf %160, %161 : vector<16x128xf32>
    %163 = arith.addf %104, %125 : vector<16x128xf32>
    %cst_38 = arith.constant 9.000000e+00 : f32
    %164 = vector.broadcast %cst_38 : f32 to vector<16x128xf32>
    %165 = arith.mulf %164, %163 : vector<16x128xf32>
    %166 = arith.subf %165, %160 : vector<16x128xf32>
    %cst_39 = arith.constant 7.290000e-02 : f32
    %167 = vector.broadcast %cst_39 : f32 to vector<16x128xf32>
    %168 = arith.addf %166, %167 : vector<16x128xf32>
    %169 = arith.mulf %162, %168 : vector<16x128xf32>
    %170 = tpu.reciprocal %169 {approx = true} : vector<16x128xf32> -> vector<16x128xf32>
    %171 = arith.mulf %169, %170 : vector<16x128xf32>
    %cst_40 = arith.constant 2.000000e+00 : f32
    %172 = vector.broadcast %cst_40 : f32 to vector<16x128xf32>
    %173 = arith.subf %172, %171 : vector<16x128xf32>
    %174 = arith.mulf %170, %173 : vector<16x128xf32>
    %175 = arith.mulf %157, %174 : vector<16x128xf32>
    %cst_41 = arith.constant 1.000000e+00 : f32
    %176 = vector.broadcast %cst_41 : f32 to vector<16x128xf32>
    %177 = arith.subf %176, %175 : vector<16x128xf32>
    %cst_42 = arith.constant 5.000000e-01 : f32
    %178 = vector.broadcast %cst_42 : f32 to vector<16x128xf32>
    %179 = arith.mulf %177, %178 : vector<16x128xf32>
    %cst_43 = arith.constant 0.000000e+00 : f32
    %cst_44 = arith.constant 1.000000e+00 : f32
    %180 = vector.broadcast %cst_43 : f32 to vector<16x128xf32>
    %181 = arith.maximumf %180, %179 : vector<16x128xf32>
    %182 = vector.broadcast %cst_44 : f32 to vector<16x128xf32>
    %183 = arith.minimumf %182, %181 : vector<16x128xf32>
    %c0_45 = arith.constant 0 : index
    %c0_46 = arith.constant 0 : index
    %184 = vector.load %arg3[%c0_45, %c0_46] : memref<16x128xf32, #tpu.memory_space<vmem>>, vector<16x128xf32>
    tpu.vector_store %arg3[%c0_45, %c0_46], %183 {strides = array<i32>} : memref<16x128xf32, #tpu.memory_space<vmem>>, vector<16x128xf32>,
    return
  }
  func.func @transform_0(%arg0: i32) -> (i32, i32) {
    %c0_i32 = arith.constant 0 : i32
    %c0_i32_0 = arith.constant 0 : i32
    return %c0_i32, %arg0 : i32, i32
  }
  func.func @transform_1(%arg0: i32) -> (i32, i32) {
    %c0_i32 = arith.constant 0 : i32
    %c0_i32_0 = arith.constant 0 : i32
    return %c0_i32, %arg0 : i32, i32
  }
  func.func @transform_2(%arg0: i32) -> (i32, i32) {
    %c0_i32 = arith.constant 0 : i32
    %c0_i32_0 = arith.constant 0 : i32
    return %c0_i32, %arg0 : i32, i32
  }
}

</mosaic_0001>

<bundles_post_ra>
// kernel: tpu_custom_call.1
= control target key start
LH: loop header
LB: loop body
LE: loop exit
PB: predicated region body
PF: predicated region fallthrough
CT: control target
= control target key end

     0   :  { %7 = vsyncpa [#allocation3], 0  ;;  %s663_s0 = inlined_call_operand.hbm [shape: f32[16,128], index: 0, kind: input, shape index: {}]   ;;  %s664_s1 = inlined_call_operand.hbm [shape: f32[16,128], index: 1, kind: input, shape index: {}]   ;;  %s665_s2 = inlined_call_operand.hbm [shape: f32[16,128], index: 2, kind: output, shape index: {}]  }
   0x1   :  { %8 = vsyncpa [#allocation6], 0 }
   0x2   :  { %9 = vsyncpa [#allocation4], 0  ;;  %s424_s9 = smov [#allocation2]   ;;  %s352_s13 = scalar_lea.hbm %s663_s0, 256 }
   0x3   :  { %s15_s10 = sshll.u32 %s424_s9, 4  ;;  %p353_p0 = scmp.ne.s32.totalorder %s663_s0, %s352_s13  ;;  %s16_s10 = int_to_ptr.vmem [resolvable:$true] %s15_s10 }
   0x4   :  { %p356_p1 = scmp.lt.u32.totalorder %s352_s13, %s663_s0 }
   0x6   :  { %p358_p2 = pnand %p356_p1, %p353_p0 }
   0x8   :  { %361 = shalt.err (!%p358_p2)
}
   0x9   :  { %s362_s18 = scalar_lea.vmem %s16_s10, 256  ;;  %p367_p4 = scmp.lt.s32.totalorder %s16_s10, %s16_s10 }
   0xa   :  { %p363_p3 = scmp.ne.s32.totalorder %s16_s10, %s362_s18  ;;  %p368_p5 = scmp.lt.s32.totalorder %s362_s18, %s362_s18 }
   0xc   :  { %p369_p6 = por %p368_p5, %p367_p4 }
   0xe   :  { %p370_p7 = pnand %p369_p6, %p363_p3 }
  0x10   :  { %373 = shalt.err (!%p370_p7)
}
  0x11   :  { %s425_s19 = smov 128   ;;  %s426_s20 = smov 8  }
  0x12   :  { %21 = dma.hbm_to_vmem [thread:$0]  %s663_s0, 256, %s16_s10, [#allocation3], %s425_s19, %s425_s19, %s426_s20  }
  0x13   :  { %s427_s23 = smov [#allocation5]   ;;  %s374_s27 = scalar_lea.hbm %s664_s1, 256 }
  0x14   :  { %s27_s24 = sshll.u32 %s427_s23, 4  ;;  %p375_p8 = scmp.ne.s32.totalorder %s664_s1, %s374_s27  ;;  %s28_s24 = int_to_ptr.vmem [resolvable:$true] %s27_s24 }
  0x15   :  { %p378_p9 = scmp.lt.u32.totalorder %s374_s27, %s664_s1 }
  0x17   :  { %p380_p10 = pnand %p378_p9, %p375_p8 }
  0x19   :  { %383 = shalt.err (!%p380_p10)
}
  0x1a   :  { %s384_s4 = scalar_lea.vmem %s28_s24, 256  ;;  %p389_p12 = scmp.lt.s32.totalorder %s28_s24, %s28_s24 }
  0x1b   :  { %p385_p11 = scmp.ne.s32.totalorder %s28_s24, %s384_s4  ;;  %p390_p13 = scmp.lt.s32.totalorder %s384_s4, %s384_s4 }
  0x1d   :  { %p391_p0 = por %p390_p13, %p389_p12 }
  0x1f   :  { %p392_p1 = pnand %p391_p0, %p385_p11 }
  0x21   :  { %395 = shalt.err (!%p392_p1)
}
  0x22   :  { %33 = dma.hbm_to_vmem [thread:$0]  %s664_s1, 256, %s28_s24, [#allocation6], %s425_s19, %s425_s19, %s426_s20  }
  0x23   :  { %418 = dma.done.wait [#allocation3], 256  }
  0x24   :  { %419 = vsyncadd [#allocation3], 4294967040 }
  0x25   :  { %420 = dma.done.wait [#allocation6], 256  }
  0x26   :  { %421 = vsyncadd [#allocation6], 4294967040  ;;  %v40_v0 = vld [vmem:[#allocation2] sm:$0xff]  ;;  %s428_s6 = smov 127   ;;  %s429_s7 = smov 1   ;;  %v41_v1 = vld [vmem:[#allocation2 + $0x8] sm:$0xff]  ;;  %v44_v10 = vlaneseq }
  0x27   :  { %95 = vrot.lane.b32.xlu1 %v40_v0, %s428_s6  ;;  %91 = vrot.lane.b32.xlu0 %v40_v0, %s429_s7  ;;  %v43_v2 = vld [vmem:[#allocation5 + $0x8] sm:$0xff]  ;;  %v42_v3 = vld [vmem:[#allocation5] sm:$0xff]  ;;  %v476_v4 = vmul.f32 %v41_v1, %v41_v1  ;;  %v478_v5 = vmul.f32 %v40_v0, %v40_v0  ;;  %s430_s1 = smov [#allocation7]  }
  0x28   :  { %v484_v6 = vmul.f32 %v43_v2, %v43_v2  ;;  %v486_v7 = vmul.f32 %v42_v3, %v42_v3  ;;  %v492_v8 = vmul.f32 %v43_v2, %v41_v1  ;;  %v494_v9 = vmul.f32 %v42_v3, %v40_v0  ;;  %s328_s8 = sshll.u32 %s430_s1, 4  ;;  %s329_s8 = int_to_ptr.vmem [resolvable:$true] %s328_s8 }
  0x29   :  { %v45_v11 = vand.u32 127, %v44_v10  ;;  %v514_v28 = vshrl.u32 %v44_v10, 7  ;;  %s396_s9 = scalar_lea.vmem %s329_s8, 256  ;;  %p401_p3 = scmp.lt.s32.totalorder %s329_s8, %s329_s8 }
  0x2a   :  { %p397_p2 = scmp.ne.s32.totalorder %s329_s8, %s396_s9  ;;  %p402_p4 = scmp.lt.s32.totalorder %s396_s9, %s396_s9 }
  0x2b   :  { %97 = vrot.lane.b32.xlu1 %v41_v1, %s428_s6  ;;  %93 = vrot.lane.b32.xlu0 %v41_v1, %s429_s7  ;;  %v50_v14 = vand.u32 15, %v45_v11  ;;  %v60_v42 = vadd.s32 8, %v514_v28  ;;  %v65_v43 = vand.u32 15, %v514_v28  ;;  %vm113_vm2 = vcmp.lt.s32.totalorder %v514_v28, 1 }
  0x2c   :  { %vm118_vm3 = vcmp.lt.s32.totalorder %v514_v28, 7  ;;  %p403_p5 = por %p402_p4, %p401_p3 }
  0x2d   :  { %vm500_vm0 = vcmp.eq.s32.totalorder %v50_v14, 0  ;;  %vm508_vm1 = vcmp.eq.s32.totalorder %v50_v14, 15  ;;  %v72_v54 = vand.u32 15, %v60_v42  ;;  %vm530_vm4 = vcmp.eq.s32.totalorder %v65_v43, 0 }
  0x2e   :  { %p404_p6 = pnand %p403_p5, %p397_p2 }
  0x2f   :  { %139 = vrot.lane.b32.xlu1 %v43_v2, %s429_s7  ;;  %137 = vrot.lane.b32.xlu0 %v42_v3, %s429_s7  ;;  %vm552_vm5 = vcmp.eq.s32.totalorder %v72_v54, 15 }
  0x33   :  { %143 = vrot.lane.b32.xlu1 %v43_v2, %s428_s6  ;;  %141 = vrot.lane.b32.xlu0 %v42_v3, %s428_s6 }
  0x37   :  { %173 = vrot.lane.b32.xlu1 %v476_v4, %s429_s7  ;;  %171 = vrot.lane.b32.xlu0 %v478_v5, %s429_s7 }
  0x3b   :  { %177 = vrot.lane.b32.xlu1 %v476_v4, %s428_s6  ;;  %175 = vrot.lane.b32.xlu0 %v478_v5, %s428_s6 }
  0x3f   :  { %207 = vrot.lane.b32.xlu1 %v484_v6, %s429_s7  ;;  %205 = vrot.lane.b32.xlu0 %v486_v7, %s429_s7 }
  0x43   :  { %211 = vrot.lane.b32.xlu1 %v484_v6, %s428_s6  ;;  %209 = vrot.lane.b32.xlu0 %v486_v7, %s428_s6 }
  0x47   :  { %241 = vrot.lane.b32.xlu1 %v492_v8, %s429_s7  ;;  %239 = vrot.lane.b32.xlu0 %v494_v9, %s429_s7 }
  0x4b   :  { %245 = vrot.lane.b32.xlu1 %v492_v8, %s428_s6  ;;  %243 = vrot.lane.b32.xlu0 %v494_v9, %s428_s6 }
  0x99   :  { %v96_v12 = vpop.permute.xlu1 %95  ;;  %v92_v13 = vpop.permute.xlu0 %91 }
  0x9a   :  { %v101_v21 = vsel %vm500_vm0, %v96_v12, %v92_v13  ;;  %v105_v35 = vsel %vm508_vm1, %v92_v13, %v96_v12 }
  0x9b   :  { %v107_v26 = vadd.f32 %v101_v21, %v40_v0 }
  0x9d   :  { %v98_v15 = vpop.permute.xlu1 %97  ;;  %v94_v16 = vpop.permute.xlu0 %93  ;;  %v109_v40 = vadd.f32 %v107_v26, %v105_v35 }
  0x9e   :  { %v102_v18 = vsel %vm500_vm0, %v98_v15, %v94_v16  ;;  %v106_v29 = vsel %vm508_vm1, %v94_v16, %v98_v15 }
  0x9f   :  { %v108_v22 = vadd.f32 %v102_v18, %v41_v1  ;;  %v111_v52 = vrot.slane %v109_v40, 7  ;;  %v116_v53 = vrot.slane %v109_v40, 1 }
  0xa1   :  { %v140_v19 = vpop.permute.xlu1 %139  ;;  %v138_v20 = vpop.permute.xlu0 %137  ;;  %v110_v32 = vadd.f32 %v108_v22, %v106_v29 }
  0xa3   :  { %v112_v44 = vrot.slane %v110_v32, 7  ;;  %v117_v45 = vrot.slane %v110_v32, 1 }
  0xa5   :  { %v144_v23 = vpop.permute.xlu1 %143  ;;  %v142_v24 = vpop.permute.xlu0 %141  ;;  %v115_v57 = vsel %vm113_vm2, %v112_v44, %v111_v52  ;;  %v119_v58 = vsel %vm118_vm3, %v116_v53, %v117_v45  ;;  %v114_v11 = vsel %vm113_vm2, %v111_v52, %v112_v44  ;;  %v120_v12 = vsel %vm118_vm3, %v117_v45, %v116_v53 }
  0xa6   :  { %v146_v27 = vsel %vm500_vm0, %v144_v23, %v140_v19  ;;  %v145_v31 = vsel %vm500_vm0, %v142_v24, %v138_v20  ;;  %v148_v33 = vsel %vm508_vm1, %v140_v19, %v144_v23  ;;  %v147_v37 = vsel %vm508_vm1, %v138_v20, %v142_v24 }
  0xa7   :  { %v150_v30 = vadd.f32 %v146_v27, %v43_v2  ;;  %v149_v34 = vadd.f32 %v145_v31, %v42_v3  ;;  %v134_v27 = vadd.f32 %v114_v11, %v110_v32  ;;  %v132_v29 = vsel %vm552_vm5, %v114_v11, %v120_v12 }
  0xa9   :  { %v152_v36 = vadd.f32 %v150_v30, %v148_v33  ;;  %v174_v38 = vpop.permute.xlu1 %173  ;;  %v172_v39 = vpop.permute.xlu0 %171  ;;  %v151_v41 = vadd.f32 %v149_v34, %v147_v37  ;;  %v590_v44 = vadd.f32 %v134_v27, %v132_v29 }
  0xab   :  { %v154_v46 = vrot.slane %v152_v36, 7  ;;  %v158_v47 = vrot.slane %v152_v36, 1  ;;  %v153_v48 = vrot.slane %v151_v41, 7  ;;  %v157_v49 = vrot.slane %v151_v41, 1 }
  0xad   :  { %v178_v50 = vpop.permute.xlu1 %177  ;;  %v176_v51 = vpop.permute.xlu0 %175  ;;  %v156_v61 = vsel %vm113_vm2, %v154_v46, %v153_v48  ;;  %v159_v62 = vsel %vm118_vm3, %v157_v49, %v158_v47  ;;  %v155_v14 = vsel %vm113_vm2, %v153_v48, %v154_v46  ;;  %v160_v15 = vsel %vm118_vm3, %v158_v47, %v157_v49 }
  0xae   :  { %v180_v56 = vsel %vm500_vm0, %v178_v50, %v174_v38  ;;  %v179_v60 = vsel %vm500_vm0, %v176_v51, %v172_v39  ;;  %v182_v63 = vsel %vm508_vm1, %v174_v38, %v178_v50  ;;  %v161_v16 = vsel %vm530_vm4, %v159_v62, %v156_v61 }
  0xaf   :  { %v184_v59 = vadd.f32 %v180_v56, %v476_v4  ;;  %v183_v0 = vadd.f32 %v179_v60, %v478_v5  ;;  %v181_v4 = vsel %vm508_vm1, %v172_v39, %v176_v51  ;;  %v125_v5 = vsel %vm530_vm4, %v119_v58, %v115_v57 }
  0xb0   :  { %v133_v26 = vadd.f32 %v125_v5, %v109_v40  ;;  %v164_v30 = vsel %vm552_vm5, %v155_v14, %v160_v15  ;;  %v165_v31 = vadd.f32 %v161_v16, %v151_v41  ;;  %v166_v33 = vadd.f32 %v155_v14, %v152_v36 }
  0xb1   :  { %v208_v1 = vpop.permute.xlu1 %207  ;;  %v206_v2 = vpop.permute.xlu0 %205  ;;  %v186_v3 = vadd.f32 %v184_v59, %v182_v63  ;;  %v185_v13 = vadd.f32 %v183_v0, %v181_v4 }
  0xb2   :  { %v588_v43 = vadd.f32 %v133_v26, %v119_v58  ;;  %v594_v46 = vadd.f32 %v165_v31, %v159_v62  ;;  %v596_v47 = vadd.f32 %v166_v33, %v164_v30 }
  0xb3   :  { %v188_v18 = vrot.slane %v186_v3, 7  ;;  %v192_v19 = vrot.slane %v186_v3, 1  ;;  %v187_v20 = vrot.slane %v185_v13, 7  ;;  %v191_v21 = vrot.slane %v185_v13, 1 }
  0xb4   :  { %v288_v11 = vmul.f32 %v596_v47, %v596_v47  ;;  %v287_v5 = vmul.f32 %v594_v46, %v594_v46  ;;  %v272_v28 = vmul.f32 %v596_v47, %v590_v44  ;;  %v271_v55 = vmul.f32 %v594_v46, %v588_v43 }
  0xb5   :  { %v212_v22 = vpop.permute.xlu1 %211  ;;  %v210_v23 = vpop.permute.xlu0 %209  ;;  %v190_v34 = vsel %vm113_vm2, %v188_v18, %v187_v20  ;;  %v193_v35 = vsel %vm118_vm3, %v191_v21, %v192_v19  ;;  %v189_v40 = vsel %vm113_vm2, %v187_v20, %v188_v18  ;;  %v194_v41 = vsel %vm118_vm3, %v192_v19, %v191_v21 }
  0xb6   :  { %v214_v24 = vsel %vm500_vm0, %v212_v22, %v208_v1  ;;  %v213_v38 = vsel %vm500_vm0, %v210_v23, %v206_v2  ;;  %v216_v36 = vsel %vm508_vm1, %v208_v1, %v212_v22  ;;  %v215_v45 = vsel %vm508_vm1, %v206_v2, %v210_v23 }
  0xb7   :  { %v218_v37 = vadd.f32 %v214_v24, %v484_v6  ;;  %v217_v42 = vadd.f32 %v213_v38, %v486_v7  ;;  %v195_v48 = vsel %vm530_vm4, %v193_v35, %v190_v34  ;;  %v198_v50 = vsel %vm552_vm5, %v189_v40, %v194_v41 }
  0xb8   :  { %v200_v7 = vadd.f32 %v189_v40, %v186_v3  ;;  %v199_v60 = vadd.f32 %v195_v48, %v185_v13  ;;  %v285_v22 = vmul.f32 %v588_v43, %v588_v43  ;;  %v286_v23 = vmul.f32 %v590_v44, %v590_v44 }
  0xb9   :  { %v242_v32 = vpop.permute.xlu1 %241  ;;  %v240_v39 = vpop.permute.xlu0 %239  ;;  %v220_v6 = vadd.f32 %v218_v37, %v216_v36  ;;  %v219_v49 = vadd.f32 %v217_v42, %v215_v45 }
  0xba   :  { %v201_v14 = vadd.f32 %v199_v60, %v193_v35  ;;  %v202_v15 = vadd.f32 %v200_v7, %v198_v50  ;;  %v289_v29 = vadd.f32 %v287_v5, %v285_v22  ;;  %v290_v31 = vadd.f32 %v288_v11, %v286_v23 }
  0xbb   :  { %v222_v51 = vrot.slane %v220_v6, 7  ;;  %v226_v52 = vrot.slane %v220_v6, 1  ;;  %v221_v56 = vrot.slane %v219_v49, 7  ;;  %v225_v57 = vrot.slane %v219_v49, 1 }
  0xbc   :  { %v291_v48 = vadd.f32 0.0081, %v289_v29 }
  0xbd   :  { %v246_v53 = vpop.permute.xlu1 %245  ;;  %v244_v54 = vpop.permute.xlu0 %243  ;;  %v223_v0 = vsel %vm113_vm2, %v221_v56, %v222_v51  ;;  %v224_v1 = vsel %vm113_vm2, %v222_v51, %v221_v56  ;;  %v227_v2 = vsel %vm118_vm3, %v225_v57, %v226_v52  ;;  %v228_v3 = vsel %vm118_vm3, %v226_v52, %v225_v57 }
  0xbe   :  { %v248_v58 = vsel %vm500_vm0, %v246_v53, %v242_v32  ;;  %v250_v59 = vsel %vm508_vm1, %v242_v32, %v246_v53  ;;  %v247_v62 = vsel %vm500_vm0, %v244_v54, %v240_v39  ;;  %v249_v63 = vsel %vm508_vm1, %v240_v39, %v244_v54 }
  0xbf   :  { %v252_v61 = vadd.f32 %v248_v58, %v492_v8  ;;  %v229_v8 = vsel %vm530_vm4, %v227_v2, %v224_v1  ;;  %v232_v17 = vsel %vm552_vm5, %v223_v0, %v228_v3  ;;  %v234_v25 = vadd.f32 %v223_v0, %v220_v6 }
  0xc0   :  { %v233_v12 = vadd.f32 %v229_v8, %v219_v49  ;;  %v251_v13 = vadd.f32 %v247_v62, %v494_v9  ;;  %v292_v6 = vadd.f32 0.0081, %v290_v31  ;;  %v274_v54 = vmul.f32 2.0, %v272_v28 }
  0xc1   :  { %v254_v4 = vadd.f32 %v252_v61, %v250_v59  ;;  %v236_v16 = vadd.f32 %v234_v25, %v232_v17  ;;  %v273_v56 = vmul.f32 2.0, %v271_v55 }
  0xc2   :  { %v235_v18 = vadd.f32 %v233_v12, %v227_v2  ;;  %v253_v21 = vadd.f32 %v251_v13, %v249_v63  ;;  %v276_v1 = vadd.f32 0.0081, %v274_v54 }
  0xc3   :  { %v256_v19 = vrot.slane %v254_v4, 7  ;;  %v260_v20 = vrot.slane %v254_v4, 1  ;;  %v294_v24 = vadd.f32 %v236_v16, %v202_v15  ;;  %v275_v3 = vadd.f32 0.0081, %v273_v56 }
  0xc4   :  { %v293_v26 = vadd.f32 %v235_v18, %v201_v14  ;;  %v255_v27 = vrot.slane %v253_v21, 7  ;;  %v259_v9 = vrot.slane %v253_v21, 1 }
  0xc5   :  { %v296_v30 = vmul.f32 9.0, %v294_v24 }
  0xc6   :  { %v295_v33 = vmul.f32 9.0, %v293_v26  ;;  %v257_v34 = vsel %vm113_vm2, %v255_v27, %v256_v19  ;;  %v258_v35 = vsel %vm113_vm2, %v256_v19, %v255_v27  ;;  %v261_v37 = vsel %vm118_vm3, %v259_v9, %v260_v20 }
  0xc7   :  { %v262_v38 = vsel %vm118_vm3, %v260_v20, %v259_v9  ;;  %v263_v32 = vsel %vm530_vm4, %v261_v37, %v258_v35  ;;  %v298_v39 = vsub.f32 %v296_v30, %v290_v31  ;;  %v268_v41 = vadd.f32 %v257_v34, %v254_v4 }
  0xc8   :  { %v297_v40 = vsub.f32 %v295_v33, %v289_v29  ;;  %v266_v36 = vsel %vm552_vm5, %v257_v34, %v262_v38  ;;  %v267_v42 = vadd.f32 %v263_v32, %v253_v21 }
  0xc9   :  { %v300_v45 = vadd.f32 0.0729, %v298_v39  ;;  %v270_v7 = vadd.f32 %v268_v41, %v266_v36 }
  0xca   :  { %v299_v49 = vadd.f32 0.0729, %v297_v40  ;;  %v269_v52 = vadd.f32 %v267_v42, %v261_v37 }
  0xcb   :  { %v302_v50 = vmul.f32 %v300_v45, %v292_v6  ;;  %v278_v53 = vmul.f32 18.0, %v270_v7 }
  0xcc   :  { %v301_v51 = vmul.f32 %v299_v49, %v291_v48  ;;  %v277_v10 = vmul.f32 18.0, %v269_v52 }
  0xcd   :  { %348 = vrcp.f32 %v302_v50  ;;  %v280_v57 = vsub.f32 %v278_v53, %v274_v54 }
  0xce   :  { %350 = vrcp.f32 %v301_v51  ;;  %v279_v58 = vsub.f32 %v277_v10, %v273_v56 }
  0xcf   :  { %v282_v61 = vadd.f32 0.0729, %v280_v57 }
  0xd0   :  { %v281_v63 = vadd.f32 0.0729, %v279_v58 }
  0xd1   :  { %v284_v47 = vmul.f32 %v282_v61, %v276_v1 }
  0xd2   :  { %v283_v17 = vmul.f32 %v281_v63, %v275_v3 }
  0xd7   :  { %v349_v59 = vpop.eup %348 }
  0xd8   :  { %v351_v60 = vpop.eup %350  ;;  %v306_v62 = vmul.f32 %v349_v59, %v302_v50 }
  0xd9   :  { %v305_v0 = vmul.f32 %v351_v60, %v301_v51 }
  0xda   :  { %v308_v2 = vsub.f32 2.0, %v306_v62 }
  0xdb   :  { %v307_v44 = vsub.f32 2.0, %v305_v0 }
  0xdc   :  { %v310_v8 = vmul.f32 %v349_v59, %v308_v2 }
  0xdd   :  { %v309_v43 = vmul.f32 %v351_v60, %v307_v44 }
  0xde   :  { %v312_v46 = vmul.f32 %v310_v8, %v284_v47 }
  0xdf   :  { %v311_v25 = vmul.f32 %v309_v43, %v283_v17 }
  0xe0   :  { %v314_v4 = vsub.f32 1.0, %v312_v46 }
  0xe1   :  { %v313_v11 = vsub.f32 1.0, %v311_v25 }
  0xe2   :  { %v316_v12 = vmul.f32 0.5, %v314_v4 }
  0xe3   :  { %v315_v13 = vmul.f32 0.5, %v313_v11 }
  0xe4   :  { %v318_v5 = vmax.f32 %v316_v12, 0.0 }
  0xe5   :  { %v317_v14 = vmax.f32 %v315_v13, 0.0 }
  0xe6   :  { %v320_v15 = vmin.f32 %v318_v5, 1.0 }
  0xe7   :  { %v319_v16 = vmin.f32 %v317_v14, 1.0 }
  0xe8   :  { %322 = vst [vmem:[#allocation7 + $0x8] sm:$0xff] %v320_v15 }
  0xe9   :  { %321 = vst [vmem:[#allocation7] sm:$0xff] %v319_v16 }
  0xea   :  { %407 = shalt.err (!%p404_p6)
}
  0xeb   :  { %s408_s12 = scalar_lea.hbm %s665_s2, 256 }
  0xec   :  { %p409_p7 = scmp.ne.s32.totalorder %s665_s2, %s408_s12  ;;  %p412_p8 = scmp.lt.u32.totalorder %s408_s12, %s665_s2 }
  0xee   :  { %p414_p9 = pnand %p412_p8, %p409_p7 }
  0xf0   :  { %417 = shalt.err (!%p414_p9)
}
  0xf1   :  { %334 = dma.vmem_to_hbm [thread:$0]  %s329_s8, 256, %s665_s2, [#allocation4], %s425_s19, %s425_s19, %s426_s20  }
  0xf2   :  { %422 = dma.done.wait [#allocation4], 256  }
  0xf3   :  { %423 = vsyncadd [#allocation4], 4294967040 }
  0xf4   :  { %338 = vsyncpa [#allocation3], 1 }
  0xf5   :  { %339 = vsyncpa [#allocation6], 1 }
  0xf6   :  { %340 = vsyncpa [#allocation4], 1 }

</bundles_post_ra>
